<compile_context>
chip_gen: v7x
topology: tpu7x:2x2x1
jax: 0.10.0
libtpu: 0.0.40
codegen_flags: <defaults>
</compile_context>

<pallas_src>
import jax
import jax.numpy as jnp
from jax.experimental import pallas as pl
from jax.experimental.pallas import tpu as pltpu


def timestep_kernel(h_ref, w1_ref, b1_ref, w23_row_ref, b23_ref, v_ref):
    """v = relu(h @ W1 + b1) @ W23 + b23, with the 1-wide head as a VPU reduce."""
    h = h_ref[...]  # (TM, hsize); MXU accumulates in f32 via preferred_element_type

    # Linear(hsize, hsize) + ReLU  -- the only MXU matmul left after folding.
    x1 = jnp.dot(h, w1_ref[...], preferred_element_type=jnp.float32) + b1_ref[...]
    x1 = jnp.maximum(x1, 0.0)

    # Fused (Linear(hsize,hsize) -> Linear(hsize,1)) value head as a
    # VPU multiply + lane reduction instead of a 1-column MXU matmul.
    v = jnp.sum(x1 * w23_row_ref[...], axis=-1, keepdims=True) + b23_ref[...]

    v_ref[...] = v.astype(v_ref.dtype)


def timestep_forward(h, w1, b1, w2, b2, w3, b3, *, tm=512):
    """h: (N, hsize) -> v: (N, 1). Batch-gridded, weights VMEM-resident."""
    n, hsize = h.shape

    # Algebraic fold of the last two Linears (no nonlinearity between them).
    w23 = w2 @ w3                                  # (hsize, 1)
    b23 = b2 @ w3 + b3                             # (1, 1)
    w23_row = w23.reshape(1, hsize)                # lane-resident row for the VPU reduce

    # Pick a row tile: multiple of 8 (f32 sublane), capped at `tm`.
    n8 = max(8, pl.cdiv(n, 8) * 8)
    tm = min(tm, n8)
    n_pad = pl.cdiv(n, tm) * tm
    if n_pad != n:
        h = jnp.pad(h, ((0, n_pad - n), (0, 0)))

    grid = (n_pad // tm,)

    out = pl.pallas_call(
        timestep_kernel,
        out_shape=jax.ShapeDtypeStruct((n_pad, 1), h.dtype),
        grid=grid,
        in_specs=[
            pl.BlockSpec((tm, hsize), lambda i: (i, 0)),        # h tile (double-buffered)
            pl.BlockSpec((hsize, hsize), lambda i: (0, 0)),     # W1 (resident)
            pl.BlockSpec((1, hsize), lambda i: (0, 0)),         # b1 (resident)
            pl.BlockSpec((1, hsize), lambda i: (0, 0)),         # W23 row (resident)
            pl.BlockSpec((1, 1), lambda i: (0, 0)),             # b23 (resident)
        ],
        out_specs=pl.BlockSpec((tm, 1), lambda i: (i, 0)),
        compiler_params=pltpu.CompilerParams(
            dimension_semantics=("parallel",),                   # shard batch over TCs (v7x)
        ),
    )(h, w1, b1, w23_row, b23)

    return out[:n]


def init_params(key, hsize):
    """Deterministic init mimicking PyTorch Linear default (U[-1/sqrt(fan_in), +])."""
    ks = jax.random.split(key, 6)
    bound = 1.0 / jnp.sqrt(hsize)

    # nn.Linear stores weight as (out, in); we keep (in, out) for x @ W.
    w1 = jax.random.uniform(ks[0], (hsize, hsize), jnp.float32, -bound, bound)
    b1 = jax.random.uniform(ks[1], (1, hsize), jnp.float32, -bound, bound)
    w2 = jax.random.uniform(ks[2], (hsize, hsize), jnp.float32, -bound, bound)
    b2 = jax.random.uniform(ks[3], (1, hsize), jnp.float32, -bound, bound)
    w3 = jax.random.uniform(ks[4], (hsize, 1), jnp.float32, -bound, bound)
    b3 = jax.random.uniform(ks[5], (1, 1), jnp.float32, -bound, bound)
    return w1, b1, w2, b2, w3, b3


def reference_forward(h, w1, b1, w2, b2, w3, b3):
    """Unfused pure-JAX reference matching the PyTorch module exactly."""
    x1 = jnp.maximum(h @ w1 + b1, 0.0)
    x2 = x1 @ w2 + b2
    return x2 @ w3 + b3


if __name__ == "__main__":
    hsize = 64   # module default
    batch = 8    # small batch of "nodes"

    key = jax.random.PRNGKey(0)
    k_h, k_p = jax.random.split(key)

    h = jax.random.normal(k_h, (batch, hsize), dtype=jnp.float32)
    params = init_params(k_p, hsize)

    v = timestep_forward(h, *params)
    v = jax.block_until_ready(v)

    # sanity check against the unfused pure-JAX reference
    v_ref = reference_forward(h, *params)
    assert v.shape == (batch, 1)
    assert jnp.allclose(v, v_ref, atol=1e-5, rtol=1e-5), "mismatch vs reference"

    print("KERNEL_OK")
</pallas_src>

<mosaic_0001>
module attributes {stable_mosaic.version = 11 : i64} {
  func.func @timestep_kernel(%arg0: i32, %arg1: memref<8x64xf32, #tpu.memory_space<vmem>>, %arg2: memref<64x64xf32, #tpu.memory_space<vmem>>, %arg3: memref<1x64xf32, #tpu.memory_space<vmem>>, %arg4: memref<1x64xf32, #tpu.memory_space<vmem>>, %arg5: memref<1x1xf32, #tpu.memory_space<vmem>>, %arg6: memref<8x1xf32, #tpu.memory_space<vmem>>) attributes {dimension_semantics = [#tpu.dimension_semantics<parallel>], iteration_bounds = array<i64: 1>, scalar_prefetch = 0 : i64, scratch_operands = 0 : i64, tpu.core_type = #tpu.core_type<tc>, window_params = [{transform_indices = @transform_0, window_bounds = array<i64: 8, 64>}, {pipeline_mode = #tpu.pipeline_mode<synchronous>, transform_indices = @transform_1, window_bounds = array<i64: 64, 64>}, {pipeline_mode = #tpu.pipeline_mode<synchronous>, transform_indices = @transform_2, window_bounds = array<i64: 1, 64>}, {pipeline_mode = #tpu.pipeline_mode<synchronous>, transform_indices = @transform_3, window_bounds = array<i64: 1, 64>}, {pipeline_mode = #tpu.pipeline_mode<synchronous>, transform_indices = @transform_4, window_bounds = array<i64: 1, 1>}, {transform_indices = @transform_5, window_bounds = array<i64: 8, 1>}]} {
    %c0 = arith.constant 0 : index
    %c0_0 = arith.constant 0 : index
    %0 = vector.load %arg1[%c0, %c0_0] : memref<8x64xf32, #tpu.memory_space<vmem>>, vector<8x64xf32>
    %c0_1 = arith.constant 0 : index
    %c0_2 = arith.constant 0 : index
    %1 = vector.load %arg2[%c0_1, %c0_2] : memref<64x64xf32, #tpu.memory_space<vmem>>, vector<64x64xf32>
    %cst = arith.constant dense<0.000000e+00> : vector<8x64xf32>
    %2 = tpu.matmul %0, %1, %cst {dimension_numbers = #tpu.dot_dimension_numbers<[1], [0], [0], [1], [0, 0, 1, 1], [], []>} : vector<8x64xf32>, vector<64x64xf32>, vector<8x64xf32> -> vector<8x64xf32>
    %c0_3 = arith.constant 0 : index
    %c0_4 = arith.constant 0 : index
    %3 = vector.load %arg3[%c0_3, %c0_4] : memref<1x64xf32, #tpu.memory_space<vmem>>, vector<1x64xf32>
    %4 = vector.broadcast %3 : vector<1x64xf32> to vector<8x64xf32>
    %5 = arith.addf %2, %4 : vector<8x64xf32>
    %cst_5 = arith.constant 0.000000e+00 : f32
    %6 = vector.broadcast %cst_5 : f32 to vector<8x64xf32>
    %7 = arith.maximumf %5, %6 : vector<8x64xf32>
    %c0_6 = arith.constant 0 : index
    %c0_7 = arith.constant 0 : index
    %8 = vector.load %arg4[%c0_6, %c0_7] : memref<1x64xf32, #tpu.memory_space<vmem>>, vector<1x64xf32>
    %9 = vector.broadcast %8 : vector<1x64xf32> to vector<8x64xf32>
    %10 = arith.mulf %7, %9 : vector<8x64xf32>
    %cst_8 = arith.constant dense<0.000000e+00> : vector<8xf32>
    %11 = vector.multi_reduction <add>, %10, %cst_8 [1] : vector<8x64xf32> to vector<8xf32>
    %12 = vector.shape_cast %11 : vector<8xf32> to vector<8x1xf32>
    %c0_9 = arith.constant 0 : index
    %c0_10 = arith.constant 0 : index
    %13 = vector.load %arg5[%c0_9, %c0_10] : memref<1x1xf32, #tpu.memory_space<vmem>>, vector<1x1xf32>
    %14 = vector.broadcast %13 : vector<1x1xf32> to vector<8x1xf32>
    %15 = arith.addf %12, %14 : vector<8x1xf32>
    %c0_11 = arith.constant 0 : index
    %c0_12 = arith.constant 0 : index
    %16 = vector.load %arg6[%c0_11, %c0_12] : memref<8x1xf32, #tpu.memory_space<vmem>>, vector<8x1xf32>
    tpu.vector_store %arg6[%c0_11, %c0_12], %15 {strides = array<i32>} : memref<8x1xf32, #tpu.memory_space<vmem>>, vector<8x1xf32>,
    return
  }
  func.func @transform_0(%arg0: i32) -> (i32, i32) {
    %c0_i32 = arith.constant 0 : i32
    %c0_i32_0 = arith.constant 0 : i32
    return %arg0, %c0_i32 : i32, i32
  }
  func.func @transform_1(%arg0: i32) -> (i32, i32) {
    %c0_i32 = arith.constant 0 : i32
    %c0_i32_0 = arith.constant 0 : i32
    %c0_i32_1 = arith.constant 0 : i32
    return %c0_i32, %c0_i32_0 : i32, i32
  }
  func.func @transform_2(%arg0: i32) -> (i32, i32) {
    %c0_i32 = arith.constant 0 : i32
    %c0_i32_0 = arith.constant 0 : i32
    %c0_i32_1 = arith.constant 0 : i32
    return %c0_i32, %c0_i32_0 : i32, i32
  }
  func.func @transform_3(%arg0: i32) -> (i32, i32) {
    %c0_i32 = arith.constant 0 : i32
    %c0_i32_0 = arith.constant 0 : i32
    %c0_i32_1 = arith.constant 0 : i32
    return %c0_i32, %c0_i32_0 : i32, i32
  }
  func.func @transform_4(%arg0: i32) -> (i32, i32) {
    %c0_i32 = arith.constant 0 : i32
    %c0_i32_0 = arith.constant 0 : i32
    %c0_i32_1 = arith.constant 0 : i32
    return %c0_i32, %c0_i32_0 : i32, i32
  }
  func.func @transform_5(%arg0: i32) -> (i32, i32) {
    %c0_i32 = arith.constant 0 : i32
    %c0_i32_0 = arith.constant 0 : i32
    return %arg0, %c0_i32 : i32, i32
  }
}

</mosaic_0001>

<bundles_post_ra>
// kernel: tpu_custom_call.1
= control target key start
LH: loop header
LB: loop body
LE: loop exit
PB: predicated region body
PF: predicated region fallthrough
CT: control target
= control target key end

     0   :  { %s345_s0 = inlined_call_operand.hbm [shape: f32[8,64], index: 0, kind: input, shape index: {}]   ;;  %s346_s1 = inlined_call_operand.hbm [shape: f32[64,64], index: 1, kind: input, shape index: {}]   ;;  %s347_s2 = inlined_call_operand.vmem [shape: f32[1,64], index: 2, kind: input, shape index: {}]   ;;  %s348_s3 = inlined_call_operand.vmem [shape: f32[1,64], index: 3, kind: input, shape index: {}]   ;;  %s349_s4 = inlined_call_operand.<no memory space> [shape: f32[1,1], index: 4, kind: input, shape index: {}]   ;;  %s350_s5 = inlined_call_operand.vmem [shape: f32[8,1], index: 5, kind: output, shape index: {}]  }
   0x1   :  { %v10_v0 = vstv %s349_s4 }
   0x2   :  { %11 = vst [vmem:[#allocation2] sm:$0x1] %v10_v0 }
   0x3   :  { %12 = vsyncpa [#allocation4], 0 }
   0x4   :  { %13 = vsyncpa [#allocation6], 0  ;;  %s265_s20 = smov [#allocation3]   ;;  %s266_s22 = smov [#allocation5]  }
   0x5   :  { %s20_s21 = sshll.u32 %s265_s20, 4  ;;  %s29_s23 = sshll.u32 %s266_s22, 4  ;;  %s21_s21 = int_to_ptr.vmem [resolvable:$true] %s20_s21  ;;  %s305_s23 = int_to_ptr.vmem [resolvable:$true] %s29_s23 }
   0x6   :  { %s217_s26 = scalar_lea.hbm %s345_s0, 128 }
   0x7   :  { %p218_p0 = scmp.ne.s32.totalorder %s345_s0, %s217_s26  ;;  %p221_p1 = scmp.lt.u32.totalorder %s217_s26, %s345_s0 }
   0x9   :  { %p223_p2 = pnand %p221_p1, %p218_p0 }
   0xb   :  { %226 = shalt.err (!%p223_p2)
}
   0xc   :  { %s227_s30 = scalar_lea.vmem %s21_s21, 128  ;;  %p232_p4 = scmp.lt.s32.totalorder %s21_s21, %s21_s21 }
   0xd   :  { %p228_p3 = scmp.ne.s32.totalorder %s21_s21, %s227_s30  ;;  %p233_p5 = scmp.lt.s32.totalorder %s227_s30, %s227_s30 }
   0xf   :  { %p234_p6 = por %p233_p5, %p232_p4 }
  0x11   :  { %p235_p7 = pnand %p234_p6, %p228_p3 }
  0x13   :  { %238 = shalt.err (!%p235_p7)
}
  0x14   :  { %23 = dma.hbm_to_vmem [thread:$0]  %s345_s0, 128, %s21_s21, [#allocation4]  }
  0x15   :  { %s239_s10 = scalar_lea.hbm %s346_s1, 1024 }
  0x16   :  { %p240_p8 = scmp.ne.s32.totalorder %s346_s1, %s239_s10  ;;  %p243_p9 = scmp.lt.u32.totalorder %s239_s10, %s346_s1 }
  0x18   :  { %p245_p10 = pnand %p243_p9, %p240_p8 }
  0x1a   :  { %248 = shalt.err (!%p245_p10)
}
  0x1b   :  { %s249_s15 = scalar_lea.vmem %s305_s23, 1024  ;;  %p254_p12 = scmp.lt.s32.totalorder %s305_s23, %s305_s23 }
  0x1c   :  { %p250_p11 = scmp.ne.s32.totalorder %s305_s23, %s249_s15  ;;  %p255_p13 = scmp.lt.s32.totalorder %s249_s15, %s249_s15 }
  0x1e   :  { %p256_p0 = por %p255_p13, %p254_p12 }
  0x20   :  { %p257_p1 = pnand %p256_p0, %p250_p11 }
  0x22   :  { %260 = shalt.err (!%p257_p1)
}
  0x23   :  { %s267_s0 = smov 128   ;;  %s268_s16 = smov 8  }
  0x24   :  { %35 = dma.hbm_to_vmem [thread:$0]  %s346_s1, 1024, %s305_s23, [#allocation6], %s267_s0, %s267_s0, %s268_s16  }
  0x25   :  { %261 = dma.done.wait [#allocation4], 128  }
  0x26   :  { %262 = vsyncadd [#allocation4], 4294967168 }
  0x27   :  { %263 = dma.done.wait [#allocation6], 1024  }
  0x28   :  { %264 = vsyncadd [#allocation6], 4294966272  ;;  %v269_v1 = vmov 0.0|0.0   ;;  %vm270_vm0 = vmmov 0   ;;  %v271_v2 = vmov 0.0   ;;  %v49_v3 = vld [vmem:[#allocation5] sm:$0xff] }
  0x29   :  { %198 = vmatprep.subr.bf16.mxu0 %v269_v1  ;;  %195 = vmatprep.mubr.msk.f32.mxu0 %vm270_vm0, %v271_v2  ;;  %v50_v4 = vld [vmem:[#allocation5 + $0x8] sm:$0xff]  ;;  %v51_v5 = vld [vmem:[#allocation5 + $0x10] sm:$0xff]  ;;  %v52_v7 = vld [vmem:[#allocation5 + $0x18] sm:$0xff]  ;;  %vm64_vm1 = vcmask 523264   ;;  %vm158_vm2 = vcmask 7168  }
  0x2a   :  { %v199_v6 = vpack.c.bf16 %v50_v4, %v49_v3  ;;  %v202_v8 = vpack.c.bf16 %v52_v7, %v51_v5  ;;  %v53_v9 = vld [vmem:[#allocation5 + $0x20] sm:$0xff]  ;;  %v54_v10 = vld [vmem:[#allocation5 + $0x28] sm:$0xff]  ;;  %v55_v12 = vld [vmem:[#allocation5 + $0x30] sm:$0xff] }
  0x2b   :  { %v205_v11 = vpack.c.bf16 %v54_v10, %v53_v9  ;;  %v56_v13 = vld [vmem:[#allocation5 + $0x38] sm:$0xff]  ;;  %v166_v16 = vld [vmem:[%s347_s2] ss:$0 sm:$0xff] }
  0x2c   :  { %200 = vmatpush3.bf16.msra.mxu0 %v199_v6  ;;  %v208_v14 = vpack.c.bf16 %v56_v13, %v55_v12  ;;  %v48_v15 = vld [vmem:[#allocation3] sm:$0xff]  ;;  %v168_v20 = vld [vmem:[%s348_s3] ss:$0 sm:$0xff] }
  0x2d   :  { %201 = vmatprep.subr.bf16.mxu0 %v269_v1  ;;  %v169_v24 = vld [vmem:[#allocation2] ss:$0 sm:$0xff] }
  0x30   :  { %203 = vmatpush3.bf16.msra.mxu0 %v202_v8 }
  0x31   :  { %204 = vmatprep.subr.bf16.mxu0 %v269_v1 }
  0x34   :  { %206 = vmatpush3.bf16.msra.mxu0 %v205_v11 }
  0x35   :  { %207 = vmatprep.subr.bf16.mxu0 %v269_v1 }
  0x38   :  { %209 = vmatpush3.bf16.msra.mxu0 %v208_v14 }
  0x3b   :  { %196 = vmatmul.mubr.msk.f32.vlgmr.msra.gmra.mrb[0].mxu0 %vm64_vm1, %v48_v15 }
 0x10e   :  { %v134_v17 = vpop.f32.mrb[0].mxu0 }
 0x10f   :  { %v135_v18 = vadd.f32 %v166_v16, %v134_v17  ;;  %v197_v19 = vpop.f32.mrb[1].mxu0 }
 0x111   :  { %v138_v21 = vmax.f32 %v135_v18, 0.0 }
 0x113   :  { %v146_v22 = vmul.f32 %v168_v20, %v138_v21 }
 0x115   :  { %v147_v23 = vsel %vm64_vm1, %v146_v22, 0.0 }
 0x116   :  { %148 = vadd.xlane.f32.xlu0 %v147_v23 }
 0x1a3   :  { %v149_v25 = vpop.xlane.xlu0 %148 }
 0x1a4   :  { %v157_v26 = vadd.f32 %v169_v24, %v149_v25 }
 0x1a6   :  { %159 = vst.msk [vmem:[%s350_s5] sm:$0xff] %vm158_vm2, %v157_v26 }
 0x1a7   :  { %164 = vsyncpa [#allocation4], 1 }
 0x1a8   :  { %165 = vsyncpa [#allocation6], 1 }

</bundles_post_ra>
